<compile_context>
chip_gen: v7x
topology: tpu7x:2x2x1
jax: 0.10.0
libtpu: 0.0.40
codegen_flags: <defaults>
</compile_context>

<pallas_src>
import functools
import math

import jax
import jax.numpy as jnp
from jax.experimental import pallas as pl
from jax.experimental.pallas import tpu as pltpu


LANE = 128
SUBLANE = 8


# ----------------------------- in-kernel helpers ------------------------------

def _layernorm(x, eps=1e-6):
    # elementwise_affine=False LayerNorm, biased variance (matches PyTorch), f32 math.
    mu = jnp.mean(x, axis=-1, keepdims=True)
    var = jnp.mean((x - mu) ** 2, axis=-1, keepdims=True)
    return (x - mu) * jax.lax.rsqrt(var + eps)


def _silu(x):
    return x * jax.nn.sigmoid(x)


def _gelu_tanh(x):
    c = math.sqrt(2.0 / math.pi)
    return 0.5 * x * (1.0 + jnp.tanh(c * (x + 0.044715 * x * x * x)))


def _bf16(x):
    return x.astype(jnp.bfloat16)


def _round_up(x, m):
    return ((x + m - 1) // m) * m


def _vmem_limit_bytes():
    # Per-generation VMEM budget with headroom for pipeline buffers / compiler scratch
    # (~51 MiB on v7x (64 MiB physical), ~102 MiB on v5e/v6e (128 MiB physical)).
    try:
        return int(pltpu.get_tpu_info().vmem_capacity_bytes * 0.8)
    except Exception:
        return None   # fall back to the compiler default


# --------------------------------- kernels ------------------------------------

def t_cond_kernel(tf_ref, w1_ref, b1_ref, w2_ref, b2_ref, wadaf_ref, badaf_ref,
                  cs_ref, adaf_ref):
    # TimestepEmbedder MLP: Linear -> SiLU -> Linear (tiny, f32).  `cond` is only ever
    # consumed through adaLN's leading SiLU, so SiLU(cond) is emitted directly (hoisted),
    # together with the FinalLayer adaLN (shift|scale) so it is off the hot path.
    h = jnp.dot(tf_ref[...], w1_ref[...], preferred_element_type=jnp.float32) + b1_ref[...]
    h = _silu(h)
    cond = jnp.dot(h, w2_ref[...], preferred_element_type=jnp.float32) + b2_ref[...]
    cs = _silu(cond)
    cs_ref[...] = cs
    adaf_ref[...] = (jnp.dot(_bf16(cs), wadaf_ref[...],
                             preferred_element_type=jnp.float32) + badaf_ref[...])


def adaln_kernel(cs_ref, w_ref, b_ref, out_ref):
    # Per-layer adaLN modulation for all batch elements; SiLU already applied upstream.
    out_ref[0] = (jnp.dot(_bf16(cs_ref[...]), w_ref[0],
                          preferred_element_type=jnp.float32) + b_ref[0])


def dit_stack_kernel(num_heads, n_valid,
                     z_ref, pos_ref, wz_ref, bz_ref, ada_ref,
                     wqkv_ref, bqkv_ref, wproj_ref, bproj_ref,
                     w1_ref, b1_ref, w2_ref, b2_ref,
                     adaf_ref, wf_ref, bf_ref,
                     out_ref, x_ref):
    # One grid step == one DiT layer for ALL batch elements.  The residual stream lives
    # in the f32 VMEM scratch x_ref across the (sequential, "arbitrary") depth axis, so
    # per-layer weights are fetched from HBM exactly once.
    B, N, H = x_ref.shape
    nh = num_heads
    hd = H // nh
    d = pl.program_id(0)

    # -------- d == 0 prologue: z_embedder linear + masked positional embedding --------
    @pl.when(d == 0)
    def _embed():
        Lp = z_ref.shape[-1]
        z2d = z_ref[...].reshape(B * N, Lp)                        # major-dim collapse (free)
        emb = jnp.dot(z2d, wz_ref[...], preferred_element_type=jnp.float32)
        x_ref[...] = emb.reshape(B, N, H) + pos_ref[...] + bz_ref[...]

    # ---------------- one DiT block (layer d), weights loaded once -----------------
    wqkv = wqkv_ref[0]           # (3H, H)  bf16   (Q rows pre-scaled by 1/sqrt(hd))
    bqkv = bqkv_ref[0]           # (3H, 1)  f32
    wproj = wproj_ref[0]         # (H, H)   bf16
    bproj = bproj_ref[0]         # (1, H)   f32
    w1 = w1_ref[0]               # (H, Hm)  bf16
    b1 = b1_ref[0]               # (1, Hm)  f32
    w2 = w2_ref[0]               # (Hm, H)  bf16
    b2 = b2_ref[0]               # (1, H)   f32
    ada_all = ada_ref[0]         # (B, 6H)  f32

    if n_valid < N:
        key_mask = jax.lax.broadcasted_iota(jnp.int32, (1, 1, N), 2) < n_valid
    else:
        key_mask = None

    # Static loop over batch (B is small); keeps the (nh, N, N) attention intermediates
    # per-sample, which also bounds VMEM pressure.
    for b in range(B):
        x = x_ref[b]                                               # (N, H) f32 residual
        ada = ada_all[b:b + 1]                                     # (1, 6H)
        shift_msa, scale_msa, gate_msa = ada[:, 0:H], ada[:, H:2 * H], ada[:, 2 * H:3 * H]
        shift_mlp, scale_mlp, gate_mlp = ada[:, 3 * H:4 * H], ada[:, 4 * H:5 * H], ada[:, 5 * H:6 * H]

        # ---------------- attention branch ----------------
        h1 = _layernorm(x) * (1.0 + scale_msa) + shift_msa         # (N, H) f32
        # qkv^T = Wqkv . h1^T via contraction dims (no materialized transpose);
        # head split is a free major-dim reshape of the (3H, N) result.
        qkv_t = jax.lax.dot_general(wqkv, _bf16(h1), (((1,), (1,)), ((), ())),
                                    preferred_element_type=jnp.float32) + bqkv   # (3H, N)
        qkv_t = qkv_t.reshape(3 * nh, hd, N)
        q_t = qkv_t[0:nh]                                          # (nh, hd, N), pre-scaled
        k_t = qkv_t[nh:2 * nh]
        v_t = qkv_t[2 * nh:3 * nh]

        # scores straight from the transposed layout (no per-head swapaxes)
        s = jnp.einsum('hdq,hdk->hqk', _bf16(q_t), _bf16(k_t),
                       preferred_element_type=jnp.float32)          # (nh, N, N)
        if key_mask is not None:
            s = jnp.where(key_mask, s, -1e30)                       # mask padded keys
        s = s - jnp.max(s, axis=-1, keepdims=True)
        p = jnp.exp(s)
        p = _bf16(p * pl.reciprocal(jnp.sum(p, axis=-1, keepdims=True), approx=True))

        # TODO(synk): for v7x (64 MiB VMEM) with large N, tile this over KV blocks
        # (online softmax) instead of materializing the (nh, N, N) scores.
        o_t = jnp.einsum('hdk,hqk->hdq', _bf16(v_t), p,
                         preferred_element_type=jnp.float32)        # (nh, hd, N)
        attn = jax.lax.dot_general(_bf16(o_t.reshape(H, N)), wproj,
                                   (((0,), (0,)), ((), ())),
                                   preferred_element_type=jnp.float32) + bproj    # (N, H)
        # attn/proj/residual dropout layers are identity in eval mode.
        x = x + gate_msa * attn

        # ---------------- MLP branch ----------------
        h2 = _layernorm(x) * (1.0 + scale_mlp) + shift_mlp
        m = jnp.dot(_bf16(h2), w1, preferred_element_type=jnp.float32) + b1
        m = _gelu_tanh(m)
        m = jnp.dot(_bf16(m), w2, preferred_element_type=jnp.float32) + b2
        x = x + gate_mlp * m

        x_ref[b] = x

    # -------- d == last epilogue: FinalLayer (adaLN modulate + linear), fused --------
    @pl.when(d == pl.num_programs(0) - 1)
    def _final():
        adaf = adaf_ref[...]                                        # (B, 2H) precomputed
        wf = wf_ref[...]                                            # (H, Fp) bf16
        bfin = bf_ref[...]                                          # (1, Fp)
        for b in range(B):
            xb = x_ref[b]
            shift = adaf[b:b + 1, 0:H]
            scale = adaf[b:b + 1, H:2 * H]
            y = _layernorm(xb) * (1.0 + scale) + shift
            out_ref[b] = (jnp.dot(_bf16(y), wf, preferred_element_type=jnp.float32)
                          + bfin).astype(out_ref.dtype)


# ------------------------------ pallas wrappers --------------------------------

def run_t_cond(t_freq, p):
    B = t_freq.shape[0]
    H = p["t_w2"].shape[1]
    return pl.pallas_call(
        t_cond_kernel,
        out_shape=(jax.ShapeDtypeStruct((B, H), jnp.float32),
                   jax.ShapeDtypeStruct((B, 2 * H), jnp.float32)),
    )(t_freq, p["t_w1"], p["t_b1"], p["t_w2"], p["t_b2"],
      p["final"]["wada"], p["final"]["bada"])


def run_adaln(cond_silu, wada_all, bada_all):
    depth, H, H6 = wada_all.shape
    B = cond_silu.shape[0]
    return pl.pallas_call(
        adaln_kernel,
        out_shape=jax.ShapeDtypeStruct((depth, B, H6), jnp.float32),
        grid=(depth,),
        in_specs=[
            pl.BlockSpec((B, H), lambda d: (0, 0)),
            pl.BlockSpec((1, H, H6), lambda d: (d, 0, 0)),
            pl.BlockSpec((1, 1, H6), lambda d: (d, 0, 0)),
        ],
        out_specs=pl.BlockSpec((1, B, H6), lambda d: (d, 0, 0)),
        compiler_params=pltpu.CompilerParams(dimension_semantics=("parallel",)),
    )(cond_silu, wada_all, bada_all)


def run_dit_stack(z_pad, pos_masked, ada_blocks, ada_final, p, num_heads, n_valid):
    B, Np, Lp = z_pad.shape
    H = p["wz"].shape[1]
    depth = p["wqkv"].shape[0]
    Hm = p["w1"].shape[-1]
    Fp = p["final"]["wf"].shape[1]
    kernel = functools.partial(dit_stack_kernel, num_heads, n_valid)
    return pl.pallas_call(
        kernel,
        out_shape=jax.ShapeDtypeStruct((B, Np, Fp), jnp.float32),
        grid=(depth,),                                            # one step per layer
        in_specs=[
            pl.BlockSpec((B, Np, Lp), lambda d: (0, 0, 0)),       # padded latent (read once)
            pl.BlockSpec((B, Np, H), lambda d: (0, 0, 0)),        # masked positional embedding
            pl.BlockSpec((Lp, H), lambda d: (0, 0)),              # z_embedder W
            pl.BlockSpec((1, H), lambda d: (0, 0)),               # z_embedder b
            pl.BlockSpec((1, B, 6 * H), lambda d: (d, 0, 0)),     # per-layer adaLN modulation
            pl.BlockSpec((1, 3 * H, H), lambda d: (d, 0, 0)),     # Wqkv (out, in)
            pl.BlockSpec((1, 3 * H, 1), lambda d: (d, 0, 0)),     # bqkv (column)
            pl.BlockSpec((1, H, H), lambda d: (d, 0, 0)),         # Wproj
            pl.BlockSpec((1, 1, H), lambda d: (d, 0, 0)),         # bproj
            pl.BlockSpec((1, H, Hm), lambda d: (d, 0, 0)),        # mlp fc1 W
            pl.BlockSpec((1, 1, Hm), lambda d: (d, 0, 0)),        # mlp fc1 b
            pl.BlockSpec((1, Hm, H), lambda d: (d, 0, 0)),        # mlp fc2 W
            pl.BlockSpec((1, 1, H), lambda d: (d, 0, 0)),         # mlp fc2 b
            pl.BlockSpec((B, 2 * H), lambda d: (0, 0)),           # final-layer shift|scale
            pl.BlockSpec((H, Fp), lambda d: (0, 0)),              # final linear W
            pl.BlockSpec((1, Fp), lambda d: (0, 0)),              # final linear b
        ],
        out_specs=pl.BlockSpec((B, Np, Fp), lambda d: (0, 0, 0)),
        scratch_shapes=[pltpu.VMEM((B, Np, H), jnp.float32)],     # f32 residual carry
        compiler_params=pltpu.CompilerParams(
            dimension_semantics=("arbitrary",),
            vmem_limit_bytes=_vmem_limit_bytes()),
    )(z_pad, pos_masked, p["wz"], p["bz"], ada_blocks,
      p["wqkv"], p["bqkv"], p["wproj"], p["bproj"],
      p["w1"], p["b1"], p["w2"], p["b2"],
      ada_final, p["final"]["wf"], p["final"]["bf"])


# ------------------------------ plain-JAX glue ---------------------------------

def timestep_embedding(t, dim, max_period=10000):
    half = dim // 2
    freqs = jnp.exp(-math.log(max_period) * jnp.arange(half, dtype=jnp.float32) / half)
    args = t[:, None].astype(jnp.float32) * freqs[None, :]
    return jnp.concatenate([jnp.cos(args), jnp.sin(args)], axis=-1)


def get_positional_embedding(indices, embed_size, max_len=2056):
    # TODO(synk): source of get_positional_embedding not provided; this matches the
    # FrameDiff/motifflow `get_index_embedding` sinusoid (sin || cos, pi phase, max_len=2056).
    K = jnp.arange(embed_size // 2, dtype=jnp.float32)
    phase = indices[:, None].astype(jnp.float32) * math.pi / (max_len ** (2.0 * K[None, :] / embed_size))
    return jnp.concatenate([jnp.sin(phase), jnp.cos(phase)], axis=-1)


def _pad_lanes(x, mult=LANE):
    pad = (-x.shape[-1]) % mult
    if pad == 0:
        return x
    widths = [(0, 0)] * (x.ndim - 1) + [(0, pad)]
    return jnp.pad(x, widths)


def protein_latent_dit_forward(params, z, t, motif_mask, num_heads):
    B, N, _ = z.shape
    H = params["wz"].shape[1]

    pos = get_positional_embedding(jnp.arange(N), H)                   # (N, H)
    pos_masked = (pos[None, :, :] * motif_mask[:, :, None]).astype(jnp.float32)

    # lane-pad the tiny latent dim; pad N to a sublane multiple (padded keys are masked
    # in-kernel before softmax, padded rows sliced off below).
    Np = _round_up(N, SUBLANE)
    z_pad = _pad_lanes(z)
    if Np != N:
        z_pad = jnp.pad(z_pad, ((0, 0), (0, Np - N), (0, 0)))
        pos_masked = jnp.pad(pos_masked, ((0, 0), (0, Np - N), (0, 0)))
    z_pad = z_pad.astype(jnp.bfloat16)

    # timestep embedding -> SiLU(cond) (hoisted) + final-layer adaLN (one tiny kernel)
    t_freq = timestep_embedding(t, 256)
    cond_silu, ada_final = run_t_cond(t_freq, params)

    # per-layer adaLN modulation for every (layer, batch), hoisted off the hot path
    ada_blocks = run_adaln(cond_silu, params["wada"], params["bada"])  # (depth, B, 6H)

    # TODO(synk): torch.utils.checkpoint is a training-time recompute trick; forward math unchanged.
    out_pad = run_dit_stack(z_pad, pos_masked, ada_blocks, ada_final, params,
                            num_heads, n_valid=N)                      # (B, Np, Fp)
    return out_pad[:, :N, :params["final_dim"]]


# ------------------------------ parameter init ---------------------------------

def init_params(key, latent_dim, hidden, depth, num_heads, mlp_ratio, learn_sigma):
    """Kernel-ready parameters (x @ W convention, per-block weights stacked on depth,
    matmul weights pre-cast to bf16, tiny lane dims zero-padded to 128, and the
    attention 1/sqrt(head_dim) folded into the Q rows of Wqkv).

    NOTE: adaLN / final-layer weights are zero-initialized in the original module;
    deterministic random values are used here so the kernels exercise real compute.
    """
    H = hidden
    Hm = int(hidden * mlp_ratio)
    F = latent_dim * 2 if learn_sigma else latent_dim
    Lp = _round_up(latent_dim, LANE)
    Fp = _round_up(F, LANE)
    bf16 = jnp.bfloat16
    q_scale = (H // num_heads) ** -0.5

    def xavier(k, shape, fan_in, fan_out):
        limit = math.sqrt(6.0 / (fan_in + fan_out))
        return jax.random.uniform(k, shape, jnp.float32, -limit, limit)

    ks = iter(jax.random.split(key, 16))

    wz = xavier(next(ks), (latent_dim, H), latent_dim, H)
    wz = jnp.pad(wz, ((0, Lp - latent_dim), (0, 0)))                   # zero-pad dead rows

    # Wqkv stored (out, in) = (3H, H); kernel computes qkv^T = Wqkv . h1^T via dot_general.
    wqkv = xavier(next(ks), (depth, 3 * H, H), H, 3 * H)
    wqkv = wqkv.at[:, 0:H, :].multiply(q_scale)                        # fold attention scale into Q

    wf = 0.02 * jax.random.normal(next(ks), (H, F), jnp.float32)
    wf = jnp.pad(wf, ((0, 0), (0, Fp - F)))                            # zero-pad dead cols

    p = {
        "final_dim": F,
        "wz": wz.astype(bf16),
        "bz": jnp.zeros((1, H), jnp.float32),
        "t_w1": 0.02 * jax.random.normal(next(ks), (256, H), jnp.float32),
        "t_b1": jnp.zeros((1, H), jnp.float32),
        "t_w2": 0.02 * jax.random.normal(next(ks), (H, H), jnp.float32),
        "t_b2": jnp.zeros((1, H), jnp.float32),
        # stacked per-block weights, streamed layer-by-layer (fetched once per layer)
        "wada": (0.02 * jax.random.normal(next(ks), (depth, H, 6 * H), jnp.float32)).astype(bf16),
        "bada": 0.02 * jax.random.normal(next(ks), (depth, 1, 6 * H), jnp.float32),
        "wqkv": wqkv.astype(bf16),
        # TODO(synk): a lane-dense (depth, 1, 3H) bias layout would save ~1.5 MiB/buffer on
        # v7x but needs an in-kernel (1,3H)->(3H,1) relayout; column layout kept for robustness.
        "bqkv": jnp.zeros((depth, 3 * H, 1), jnp.float32),
        "wproj": xavier(next(ks), (depth, H, H), H, H).astype(bf16),
        "bproj": jnp.zeros((depth, 1, H), jnp.float32),
        "w1": xavier(next(ks), (depth, H, Hm), H, Hm).astype(bf16),
        "b1": jnp.zeros((depth, 1, Hm), jnp.float32),
        "w2": xavier(next(ks), (depth, Hm, H), Hm, H).astype(bf16),
        "b2": jnp.zeros((depth, 1, H), jnp.float32),
        "final": {
            "wada": (0.02 * jax.random.normal(next(ks), (H, 2 * H), jnp.float32)).astype(bf16),
            "bada": 0.02 * jax.random.normal(next(ks), (1, 2 * H), jnp.float32),
            "wf": wf.astype(bf16),
            "bf": jnp.zeros((1, Fp), jnp.float32),
        },
    }
    return p


# ----------------------------------- main ---------------------------------------

if __name__ == "__main__":
    B, N = 2, 8
    latent_dim, hidden, depth, num_heads, mlp_ratio = 4, 32, 2, 4, 4.0
    learn_sigma = True

    key = jax.random.PRNGKey(0)
    k_param, k_z, k_t, k_m = jax.random.split(key, 4)

    params = init_params(k_param, latent_dim, hidden, depth, num_heads, mlp_ratio, learn_sigma)
    z = jax.random.normal(k_z, (B, N, latent_dim), jnp.float32)
    t = jax.random.uniform(k_t, (B,), jnp.float32)
    motif_mask = jax.random.bernoulli(k_m, 0.5, (B, N)).astype(jnp.float32)

    out = protein_latent_dit_forward(params, z, t, motif_mask, num_heads)
    out = jax.block_until_ready(out)

    expected_dim = latent_dim * 2 if learn_sigma else latent_dim
    assert out.shape == (B, N, expected_dim), out.shape
    assert bool(jnp.all(jnp.isfinite(out)))
    print("KERNEL_OK")
</pallas_src>

<mosaic_0001>
module attributes {stable_mosaic.version = 11 : i64} {
  func.func @t_cond_kernel(%arg0: memref<2x256xf32, #tpu.memory_space<vmem>>, %arg1: memref<256x32xf32, #tpu.memory_space<vmem>>, %arg2: memref<1x32xf32, #tpu.memory_space<vmem>>, %arg3: memref<32x32xf32, #tpu.memory_space<vmem>>, %arg4: memref<1x32xf32, #tpu.memory_space<vmem>>, %arg5: memref<32x64xbf16, #tpu.memory_space<vmem>>, %arg6: memref<1x64xf32, #tpu.memory_space<vmem>>, %arg7: memref<2x32xf32, #tpu.memory_space<vmem>>, %arg8: memref<2x64xf32, #tpu.memory_space<vmem>>) attributes {dimension_semantics = [], scalar_prefetch = 0 : i64, scratch_operands = 0 : i64, tpu.core_type = #tpu.core_type<tc>} {
    %c0 = arith.constant 0 : index
    %c0_0 = arith.constant 0 : index
    %0 = vector.load %arg0[%c0, %c0_0] : memref<2x256xf32, #tpu.memory_space<vmem>>, vector<2x256xf32>
    %c0_1 = arith.constant 0 : index
    %c0_2 = arith.constant 0 : index
    %1 = vector.load %arg1[%c0_1, %c0_2] : memref<256x32xf32, #tpu.memory_space<vmem>>, vector<256x32xf32>
    %cst = arith.constant dense<0.000000e+00> : vector<2x32xf32>
    %2 = tpu.matmul %0, %1, %cst {dimension_numbers = #tpu.dot_dimension_numbers<[1], [0], [0], [1], [0, 0, 1, 1], [], []>} : vector<2x256xf32>, vector<256x32xf32>, vector<2x32xf32> -> vector<2x32xf32>
    %c0_3 = arith.constant 0 : index
    %c0_4 = arith.constant 0 : index
    %3 = vector.load %arg2[%c0_3, %c0_4] : memref<1x32xf32, #tpu.memory_space<vmem>>, vector<1x32xf32>
    %4 = vector.broadcast %3 : vector<1x32xf32> to vector<2x32xf32>
    %5 = arith.addf %2, %4 : vector<2x32xf32>
    %6 = arith.negf %5 : vector<2x32xf32>
    %7 = math.exp %6 : vector<2x32xf32>
    %cst_5 = arith.constant 1.000000e+00 : f32
    %8 = vector.broadcast %cst_5 : f32 to vector<2x32xf32>
    %9 = arith.addf %8, %7 : vector<2x32xf32>
    %10 = arith.divf %8, %9 : vector<2x32xf32>
    %11 = arith.mulf %5, %10 : vector<2x32xf32>
    %c0_6 = arith.constant 0 : index
    %c0_7 = arith.constant 0 : index
    %12 = vector.load %arg3[%c0_6, %c0_7] : memref<32x32xf32, #tpu.memory_space<vmem>>, vector<32x32xf32>
    %cst_8 = arith.constant dense<0.000000e+00> : vector<2x32xf32>
    %13 = tpu.matmul %11, %12, %cst_8 {dimension_numbers = #tpu.dot_dimension_numbers<[1], [0], [0], [1], [0, 0, 1, 1], [], []>} : vector<2x32xf32>, vector<32x32xf32>, vector<2x32xf32> -> vector<2x32xf32>
    %c0_9 = arith.constant 0 : index
    %c0_10 = arith.constant 0 : index
    %14 = vector.load %arg4[%c0_9, %c0_10] : memref<1x32xf32, #tpu.memory_space<vmem>>, vector<1x32xf32>
    %15 = vector.broadcast %14 : vector<1x32xf32> to vector<2x32xf32>
    %16 = arith.addf %13, %15 : vector<2x32xf32>
    %17 = arith.negf %16 : vector<2x32xf32>
    %18 = math.exp %17 : vector<2x32xf32>
    %cst_11 = arith.constant 1.000000e+00 : f32
    %19 = vector.broadcast %cst_11 : f32 to vector<2x32xf32>
    %20 = arith.addf %19, %18 : vector<2x32xf32>
    %21 = arith.divf %19, %20 : vector<2x32xf32>
    %22 = arith.mulf %16, %21 : vector<2x32xf32>
    %c0_12 = arith.constant 0 : index
    %c0_13 = arith.constant 0 : index
    %23 = vector.load %arg7[%c0_12, %c0_13] : memref<2x32xf32, #tpu.memory_space<vmem>>, vector<2x32xf32>
    tpu.vector_store %arg7[%c0_12, %c0_13], %22 {strides = array<i32>} : memref<2x32xf32, #tpu.memory_space<vmem>>, vector<2x32xf32>,
    %24 = arith.truncf %22 : vector<2x32xf32> to vector<2x32xbf16>
    %c0_14 = arith.constant 0 : index
    %c0_15 = arith.constant 0 : index
    %25 = vector.load %arg5[%c0_14, %c0_15] : memref<32x64xbf16, #tpu.memory_space<vmem>>, vector<32x64xbf16>
    %cst_16 = arith.constant dense<0.000000e+00> : vector<2x64xf32>
    %26 = tpu.matmul %24, %25, %cst_16 {dimension_numbers = #tpu.dot_dimension_numbers<[1], [0], [0], [1], [0, 0, 1, 1], [], []>} : vector<2x32xbf16>, vector<32x64xbf16>, vector<2x64xf32> -> vector<2x64xf32>
    %c0_17 = arith.constant 0 : index
    %c0_18 = arith.constant 0 : index
    %27 = vector.load %arg6[%c0_17, %c0_18] : memref<1x64xf32, #tpu.memory_space<vmem>>, vector<1x64xf32>
    %28 = vector.broadcast %27 : vector<1x64xf32> to vector<2x64xf32>
    %29 = arith.addf %26, %28 : vector<2x64xf32>
    %c0_19 = arith.constant 0 : index
    %c0_20 = arith.constant 0 : index
    %30 = vector.load %arg8[%c0_19, %c0_20] : memref<2x64xf32, #tpu.memory_space<vmem>>, vector<2x64xf32>
    tpu.vector_store %arg8[%c0_19, %c0_20], %29 {strides = array<i32>} : memref<2x64xf32, #tpu.memory_space<vmem>>, vector<2x64xf32>,
    return
  }
}

</mosaic_0001>

<bundles_post_ra>
// kernel: tpu_custom_call.1
= control target key start
LH: loop header
LB: loop body
LE: loop exit
PB: predicated region body
PF: predicated region fallthrough
CT: control target
= control target key end

     0   :  { %14 = vsyncpa [#allocation3], 0  ;;  %s727_s0 = inlined_call_operand.vmem [shape: f32[2,256], index: 0, kind: input, shape index: {}]   ;;  %s728_s1 = inlined_call_operand.vmem [shape: f32[256,32], index: 1, kind: input, shape index: {}]   ;;  %s729_s2 = inlined_call_operand.vmem [shape: f32[1,32], index: 2, kind: input, shape index: {}]   ;;  %s730_s3 = inlined_call_operand.vmem [shape: f32[32,32], index: 3, kind: input, shape index: {}]   ;;  %s731_s4 = inlined_call_operand.vmem [shape: f32[1,32], index: 4, kind: input, shape index: {}]   ;;  %s732_s5 = inlined_call_operand.vmem [shape: bf16[32,64], index: 5, kind: input, shape index: {}]   ;;  %s733_s6 = inlined_call_operand.vmem [shape: f32[1,64], index: 6, kind: input, shape index: {}]   ;;  %s734_s7 = inlined_call_operand.hbm [shape: f32[2,32], index: 7, kind: output, shape index: {0}]   ;;  %s735_s8 = inlined_call_operand.hbm [shape: f32[2,64], index: 8, kind: output, shape index: {1}]  }
   0x1   :  { %v48_v0 = vld [vmem:[%s728_s1 + $0x80] sm:$0xff]  ;;  %v49_v1 = vld [vmem:[%s728_s1 + $0x88] sm:$0xff]  ;;  %v50_v5 = vld [vmem:[%s728_s1 + $0x90] sm:$0xff] }
   0x2   :  { %v32_v2 = vld [vmem:[%s728_s1] sm:$0xff]  ;;  %v422_v3 = vpack.c.bf16 %v49_v1, %v48_v0  ;;  %v33_v4 = vld [vmem:[%s728_s1 + $0x8] sm:$0xff]  ;;  %v51_v6 = vld [vmem:[%s728_s1 + $0x98] sm:$0xff] }
   0x3   :  { %v424_v7 = vpack.c.bf16 %v33_v4, %v32_v2  ;;  %v426_v8 = vpack.c.bf16 %v51_v6, %v50_v5  ;;  %v34_v9 = vld [vmem:[%s728_s1 + $0x10] sm:$0xff]  ;;  %v35_v10 = vld [vmem:[%s728_s1 + $0x18] sm:$0xff]  ;;  %v52_v11 = vld [vmem:[%s728_s1 + $0xa0] sm:$0xff] }
   0x4   :  { %423 = vmatprep.subr.bf16.mxu0 %v422_v3  ;;  %v53_v12 = vld [vmem:[%s728_s1 + $0xa8] sm:$0xff]  ;;  %v428_v13 = vpack.c.bf16 %v35_v10, %v34_v9  ;;  %v36_v15 = vld [vmem:[%s728_s1 + $0x20] sm:$0xff]  ;;  %v54_v17 = vld [vmem:[%s728_s1 + $0xb0] sm:$0xff] }
   0x5   :  { %425 = vmatpush3.bf16.msra.mxu0 %v424_v7  ;;  %v430_v14 = vpack.c.bf16 %v53_v12, %v52_v11  ;;  %v37_v16 = vld [vmem:[%s728_s1 + $0x28] sm:$0xff]  ;;  %v55_v18 = vld [vmem:[%s728_s1 + $0xb8] sm:$0xff]  ;;  %v38_v21 = vld [vmem:[%s728_s1 + $0x30] sm:$0xff] }
   0x6   :  { %427 = vmatprep.subr.bf16.mxu0 %v426_v8  ;;  %v432_v19 = vpack.c.bf16 %v37_v16, %v36_v15  ;;  %v434_v20 = vpack.c.bf16 %v55_v18, %v54_v17  ;;  %v39_v22 = vld [vmem:[%s728_s1 + $0x38] sm:$0xff]  ;;  %v56_v23 = vld [vmem:[%s728_s1 + $0xc0] sm:$0xff]  ;;  %v57_v24 = vld [vmem:[%s728_s1 + $0xc8] sm:$0xff] }
   0x7   :  { %v351_v25 = vld.sshfl [vmem:[%s727_s0] sm:$0x33 pattern:$0x76325410]  ;;  %v436_v27 = vpack.c.bf16 %v39_v22, %v38_v21 }
   0x8   :  { %v79_v26 = vcombine.high %v351_v25, %v351_v25 }
   0x9   :  { %429 = vmatpush3.bf16.msra.mxu0 %v428_v13 }
   0xa   :  { %431 = vmatprep.subr.bf16.mxu0 %v430_v14 }
   0xd   :  { %433 = vmatpush3.bf16.msra.mxu0 %v432_v19 }
   0xe   :  { %15 = vsyncpa [#allocation5], 0  ;;  %435 = vmatprep.subr.bf16.mxu0 %v434_v20  ;;  %v438_v28 = vpack.c.bf16 %v57_v24, %v56_v23  ;;  %v40_v29 = vld [vmem:[%s728_s1 + $0x40] sm:$0xff]  ;;  %v41_v30 = vld [vmem:[%s728_s1 + $0x48] sm:$0xff]  ;;  %146 = vmatprep.mubr.f32.mxu0 %v79_v26  ;;  %v523_v53 = vmov 0.0|0.0   ;;  %vm524_vm0 = vmmov 0  }
   0xf   :  { %v58_v31 = vld [vmem:[%s728_s1 + $0xd0] sm:$0xff]  ;;  %v59_v32 = vld [vmem:[%s728_s1 + $0xd8] sm:$0xff]  ;;  %v440_v33 = vpack.c.bf16 %v41_v30, %v40_v29  ;;  %v60_v37 = vld [vmem:[%s728_s1 + $0xe0] sm:$0xff]  ;;  %454 = vmatprep.subr.bf16.mxu1 %v523_v53  ;;  %v525_v57 = vmov 0.0   ;;  %vm170_vm1 = vcmask 261120   ;;  %vm251_vm2 = vcmask 254976  }
  0x10   :  { %v442_v34 = vpack.c.bf16 %v59_v32, %v58_v31  ;;  %v42_v35 = vld [vmem:[%s728_s1 + $0x50] sm:$0xff]  ;;  %v43_v36 = vld [vmem:[%s728_s1 + $0x58] sm:$0xff]  ;;  %v61_v38 = vld [vmem:[%s728_s1 + $0xe8] sm:$0xff]  ;;  %411 = vmatprep.mubr.msk.f32.mxu1 %vm524_vm0, %v525_v57 }
  0x11   :  { %437 = vmatpush3.bf16.msra.mxu0 %v436_v27  ;;  %v444_v39 = vpack.c.bf16 %v43_v36, %v42_v35  ;;  %v446_v40 = vpack.c.bf16 %v61_v38, %v60_v37  ;;  %v44_v41 = vld [vmem:[%s728_s1 + $0x60] sm:$0xff]  ;;  %v45_v42 = vld [vmem:[%s728_s1 + $0x68] sm:$0xff]  ;;  %v62_v43 = vld [vmem:[%s728_s1 + $0xf0] sm:$0xff] }
  0x12   :  { %439 = vmatprep.subr.bf16.mxu0 %v438_v28  ;;  %v63_v44 = vld [vmem:[%s728_s1 + $0xf8] sm:$0xff]  ;;  %v448_v45 = vpack.c.bf16 %v45_v42, %v44_v41  ;;  %v46_v47 = vld [vmem:[%s728_s1 + $0x70] sm:$0xff]  ;;  %v159_v50 = vld [vmem:[%s730_s3] sm:$0xff] }
  0x13   :  { %v450_v46 = vpack.c.bf16 %v63_v44, %v62_v43  ;;  %v47_v48 = vld [vmem:[%s728_s1 + $0x78] sm:$0xff]  ;;  %v160_v51 = vld [vmem:[%s730_s3 + $0x8] sm:$0xff]  ;;  %v161_v54 = vld [vmem:[%s730_s3 + $0x10] sm:$0xff] }
  0x14   :  { %v452_v49 = vpack.c.bf16 %v47_v48, %v46_v47  ;;  %v455_v52 = vpack.c.bf16 %v160_v51, %v159_v50  ;;  %v162_v55 = vld [vmem:[%s730_s3 + $0x18] sm:$0xff]  ;;  %v350_v59 = vld [vmem:[%s729_s2] ss:$0 sm:$0xff]  ;;  %v466_v5 = vld [vmem:[%s732_s5 + $0x8] sm:$0xff]  }
  0x15   :  { %441 = vmatpush3.bf16.msra.mxu0 %v440_v33  ;;  %v458_v56 = vpack.c.bf16 %v162_v55, %v161_v54  ;;  %v465_v4 = vld [vmem:[%s732_s5] sm:$0xff]   ;;  %s526_s5 = smov [#allocation2]  }
  0x16   :  { %443 = vmatprep.subr.bf16.mxu0 %v442_v34  ;;  %456 = vmatpush3.bf16.msra.mxu1 %v455_v52  ;;  %v353_v6 = vld [vmem:[%s731_s4] ss:$0 sm:$0xff]  ;;  %s328_s16 = sshll.u32 %s526_s5, 4  ;;  %s329_s16 = int_to_ptr.vmem [resolvable:$true] %s328_s16 }
  0x17   :  { %457 = vmatprep.subr.bf16.mxu1 %v523_v53  ;;  %s475_s17 = scalar_lea.vmem %s329_s16, 32  ;;  %p480_p1 = scmp.lt.s32.totalorder %s329_s16, %s329_s16 }
  0x18   :  { %p476_p0 = scmp.ne.s32.totalorder %s329_s16, %s475_s17  ;;  %p481_p2 = scmp.lt.s32.totalorder %s475_s17, %s475_s17 }
  0x19   :  { %445 = vmatpush3.bf16.msra.mxu0 %v444_v39 }
  0x1a   :  { %447 = vmatprep.subr.bf16.mxu0 %v446_v40  ;;  %459 = vmatpush3.bf16.msra.mxu1 %v458_v56  ;;  %p482_p3 = por %p481_p2, %p480_p1 }
  0x1b   :  { %414 = vmatprep.subr.bf16.mxu1 %v525_v57 }
  0x1c   :  { %p483_p4 = pnand %p482_p3, %p476_p0 }
  0x1d   :  { %449 = vmatpush3.bf16.msra.mxu0 %v448_v45 }
  0x1e   :  { %451 = vmatprep.subr.bf16.mxu0 %v450_v46 }
  0x21   :  { %453 = vmatpush3.bf16.msra.mxu0 %v452_v49 }
  0x24   :  { %147 = vmatmul.mubr.f32.vlgmr.msra.gmra.mrb[0].mxu0 %v351_v25 }
  0xf7   :  { %v392_v58 = vpop.f32.mrb[0].mxu0 }
  0xf8   :  { %v393_v60 = vpop.f32.mrb[1].mxu0 }
  0xf9   :  { %v394_v61 = vadd.f32 %v393_v60, %v392_v58 }
  0xfb   :  { %v149_v62 = vadd.f32 %v394_v61, %v350_v59 }
  0xfd   :  { %v352_v63 = vmul.f32 -1.442695, %v149_v62 }
  0xff   :  { %467 = vpow2.f32 %v352_v63 }
 0x109   :  { %v468_v0 = vpop.eup %467 }
 0x10a   :  { %v155_v1 = vadd.f32 1.0, %v468_v0 }
 0x10c   :  { %469 = vrcp.f32 %v155_v1 }
 0x116   :  { %v470_v2 = vpop.eup %469 }
 0x117   :  { %v158_v3 = vmul.f32 %v470_v2, %v149_v62 }
 0x119   :  { %412 = vmatmul.mubr.msk.f32.vlgmr.msra.gmra.mrb[0].mxu1 %vm170_vm1, %v158_v3 }
 0x11a   :  { %418 = vmatprep.mubr.msk.bf16.mxu1 %vm524_vm0, %v525_v57  ;;  %415 = vmatpush3.bf16.msra.mxu1 %v465_v4 }
 0x11b   :  { %416 = vmatprep.subr.bf16.mxu1 %v525_v57 }
 0x11e   :  { %417 = vmatpush3.bf16.msra.mxu1 %v466_v5 }
 0x1ec   :  { %v240_v7 = vpop.f32.mrb[0].mxu1 }
 0x1ed   :  { %v241_v8 = vadd.f32 %v353_v6, %v240_v7  ;;  %v413_v9 = vpop.f32.mrb[1].mxu1 }
 0x1ef   :  { %v355_v10 = vmul.f32 -1.442695, %v241_v8 }
 0x1f1   :  { %471 = vpow2.f32 %v355_v10 }
 0x1fb   :  { %v472_v11 = vpop.eup %471 }
 0x1fc   :  { %v247_v12 = vadd.f32 1.0, %v472_v11 }
 0x1fe   :  { %473 = vrcp.f32 %v247_v12 }
 0x208   :  { %v474_v13 = vpop.eup %473 }
 0x209   :  { %v250_v14 = vmul.f32 %v474_v13, %v241_v8 }
 0x20b   :  { %v253_v15 = vpack.c.bf16 %v250_v14, %v250_v14  ;;  %252 = vst.msk [vmem:[#allocation2] sm:$0x3] %vm251_vm2, %v250_v14 }
 0x20d   :  { %419 = vmatmul.mubr.msk.bf16.vlgmr.msra.gmra.mrb[4].mxu1 %vm170_vm1, %v253_v15 }
 0x20e   :  { %486 = shalt.err (!%p483_p4)
}
 0x20f   :  { %s487_s19 = scalar_lea.hbm %s734_s7, 32 }
 0x210   :  { %p488_p5 = scmp.ne.s32.totalorder %s734_s7, %s487_s19  ;;  %p491_p6 = scmp.lt.u32.totalorder %s487_s19, %s734_s7 }
 0x212   :  { %p493_p7 = pnand %p491_p6, %p488_p5 }
 0x214   :  { %496 = shalt.err (!%p493_p7)
}
 0x215   :  { %331 = dma.vmem_to_hbm [thread:$0]  %s329_s16, 32, %s734_s7, [#allocation3]   ;;  %v356_v16 = vld [vmem:[%s733_s6] ss:$0 sm:$0xff]  ;;  %vm320_vm3 = vcmask 517120  }
 0x216   :  { %s527_s27 = smov [#allocation4]  }
 0x217   :  { %s338_s28 = sshll.u32 %s527_s27, 4  ;;  %s339_s28 = int_to_ptr.vmem [resolvable:$true] %s338_s28 }
 0x218   :  { %s497_s29 = scalar_lea.vmem %s339_s28, 32  ;;  %p502_p9 = scmp.lt.s32.totalorder %s339_s28, %s339_s28 }
 0x219   :  { %p498_p8 = scmp.ne.s32.totalorder %s339_s28, %s497_s29  ;;  %p503_p10 = scmp.lt.s32.totalorder %s497_s29, %s497_s29 }
 0x21b   :  { %p504_p11 = por %p503_p10, %p502_p9 }
 0x21d   :  { %p505_p12 = pnand %p504_p11, %p498_p8 }
 0x2e0   :  { %v314_v17 = vpop.f32.mrb[4].mxu1 }
 0x2e1   :  { %v315_v18 = vadd.f32 %v356_v16, %v314_v17  ;;  %v420_v19 = vpop.f32.mrb[5].mxu1 }
 0x2e2   :  { %v317_v20 = vpop.f32.mrb[6].mxu1 }
 0x2e3   :  { %v421_v21 = vpop.f32.mrb[7].mxu1  ;;  %321 = vst.msk [vmem:[#allocation4] sm:$0x3] %vm320_vm3, %v315_v18 }
 0x2e4   :  { %508 = shalt.err (!%p505_p12)
}
 0x2e5   :  { %s509_s6 = scalar_lea.hbm %s735_s8, 32 }
 0x2e6   :  { %p510_p13 = scmp.ne.s32.totalorder %s735_s8, %s509_s6  ;;  %p513_p0 = scmp.lt.u32.totalorder %s509_s6, %s735_s8 }
 0x2e8   :  { %p515_p1 = pnand %p513_p0, %p510_p13 }
 0x2ea   :  { %518 = shalt.err (!%p515_p1)
}
 0x2eb   :  { %341 = dma.vmem_to_hbm [thread:$0]  %s339_s28, 32, %s735_s8, [#allocation5]  }
 0x2ec   :  { %519 = dma.done.wait [#allocation3], 32  }
 0x2ed   :  { %520 = vsyncadd [#allocation3], 4294967264 }
 0x2ee   :  { %521 = dma.done.wait [#allocation5], 32  }
 0x2ef   :  { %522 = vsyncadd [#allocation5], 4294967264 }
 0x2f0   :  { %348 = vsyncpa [#allocation3], 1 }
 0x2f1   :  { %349 = vsyncpa [#allocation5], 1 }

</bundles_post_ra>
